<compile_context>
chip_gen: v5e
topology: v5e:2x2
jax: 0.10.0
libtpu: 0.0.40
codegen_flags: <defaults>
</compile_context>

<pallas_src>
import jax
import jax.numpy as jnp
from jax.experimental import pallas as pl
from jax.experimental.pallas import tpu as pltpu


# ----------------------------- Pallas kernel ---------------------------------

def rerank_score_kernel(sparse_w_ref, s_scores_ref, query_ref, cand_ref, out_ref):
    """score[b,k] = sparse_weight * s_scores[b,k] + <query[b,:], cand[b,k,:]>.

    VPU multiply + lane reduction with f32 accumulation.  The kernel is
    memory-bound on the candidate_embeds read, so the goal is the cheapest
    layout path: no size-1 sublane reshape, no per-batch MXU transposes.
    """
    q = query_ref[...].astype(jnp.float32)                 # (TB, H)
    c = cand_ref[...].astype(jnp.float32)                  # (TB, topk, H)
    d = jnp.sum(c * q[:, None, :], axis=-1)                # (TB, topk) f32
    # TODO(synk): topk < 128 means masked vst for the score write-back; output
    #             bytes are ~H/topk smaller than the candidate read so this is a
    #             secondary lever (a lane-dense repack would itself cost an XLU
    #             sublane->lane relayout of comparable size).
    out_ref[...] = sparse_w_ref[0] * s_scores_ref[...] + d


# ------------------------------ Pallas wrapper --------------------------------

def _round_up(x, m):
    return (x + m - 1) // m * m


def _vmem_limit_bytes():
    """Generation-aware scoped-VMEM limit: half of physical VMEM, capped at 64 MiB.

    v5e/v6e: 128 MiB physical -> 64 MiB limit.  v7x: 64 MiB physical -> 32 MiB.
    """
    try:
        cap = int(pltpu.get_tpu_info().vmem_capacity_bytes)
    except Exception:                       # off-TPU tracing / older runtimes
        cap = 64 * 1024 * 1024
    return int(min(cap // 2, 64 * 1024 * 1024))


def _choose_batch_tile(padded_b, topk, hidden, cand_dtype, vmem_limit,
                       n_steps_target=8, max_tile=None):
    """Batch tile: multiple of 16, divides padded_b, fits the VMEM budget, and
    keeps at least ~n_steps_target grid steps for pipelining / v7x 2-TC sharding."""
    ebytes = jnp.dtype(cand_dtype).itemsize
    # double-buffered pipelined I/O per batch row
    per_row = 2 * (topk * hidden * ebytes       # candidate_embeds (dominant stream)
                   + hidden * ebytes            # query_embed
                   + 2 * topk * 4)              # s_scores in + score out (f32)
    # in-kernel intermediates (single-buffered): f32 upcasts + product + d
    per_row += topk * hidden * 8 + hidden * 4 + topk * 8
    budget = int(vmem_limit * 0.75)             # ~25% headroom for relayouts etc.
    vmem_tb = max(16, (budget // per_row) // 16 * 16)
    # cap so the grid keeps >= n_steps_target steps (0.35us/step is negligible)
    steps_tb = _round_up(pl.cdiv(padded_b, n_steps_target), 16)
    desired = max(16, min(vmem_tb, steps_tb, padded_b))
    if max_tile is not None:
        desired = max(16, min(desired, (max_tile // 16) * 16))
    # largest multiple of 16 that divides padded_b and is <= desired
    for tb in range(desired, 15, -16):
        if padded_b % tb == 0:
            return tb
    return 16


def _rerank_pallas_call(sparse_weight, s_scores, query, cands, tb, vmem_limit):
    pb, topk = s_scores.shape
    hidden = query.shape[-1]
    return pl.pallas_call(
        rerank_score_kernel,
        out_shape=jax.ShapeDtypeStruct((pb, topk), jnp.float32),
        grid=(pb // tb,),
        in_specs=[
            # learnable scalar sparse_weight lives in SMEM
            pl.BlockSpec(memory_space=pltpu.MemorySpace.SMEM),
            pl.BlockSpec((tb, topk), lambda i: (i, 0)),             # s_scores
            pl.BlockSpec((tb, hidden), lambda i: (i, 0)),           # query_embed
            pl.BlockSpec((tb, topk, hidden), lambda i: (i, 0, 0)),  # candidate_embeds
        ],
        out_specs=pl.BlockSpec((tb, topk), lambda i: (i, 0)),
        compiler_params=pltpu.CompilerParams(
            # batch tiles are independent -> shard across v7x's two TensorCores
            dimension_semantics=("parallel",),
            vmem_limit_bytes=vmem_limit,
        ),
    )(sparse_weight, s_scores, query, cands)


def rerank_score(sparse_weight, candidate_s_scores, query_embed, candidate_embeds,
                 block_b=None):
    """sparse_weight: (1,) f32; s_scores: (B,topk); query: (B,H); cands: (B,topk,H).

    jit-compatible: no host sync, no try/except, shape logic only at trace time.
    """
    batch, topk = candidate_s_scores.shape
    hidden = query_embed.shape[-1]
    candidate_s_scores = candidate_s_scores.astype(jnp.float32)
    sparse_weight = sparse_weight.reshape(-1).astype(jnp.float32)

    padded_b = _round_up(batch, 16)
    vmem_limit = _vmem_limit_bytes()
    tb = _choose_batch_tile(padded_b, topk, hidden, candidate_embeds.dtype,
                            vmem_limit, max_tile=block_b)

    if padded_b != batch:
        # Bounded pad (< 16 rows) so every tile is full; training batches are
        # normally multiples of 16, so this branch is usually dead.
        # TODO(synk): for truly ragged batches mask the tail rows in-kernel
        #             instead of copying the (B, topk, H) candidate stream.
        pad = padded_b - batch
        candidate_s_scores = jnp.pad(candidate_s_scores, ((0, pad), (0, 0)))
        query_embed = jnp.pad(query_embed, ((0, pad), (0, 0)))
        candidate_embeds = jnp.pad(candidate_embeds, ((0, pad), (0, 0), (0, 0)))

    out = _rerank_pallas_call(sparse_weight, candidate_s_scores, query_embed,
                              candidate_embeds, tb, vmem_limit)
    return out[:batch]


# ------------------------- deterministic stand-in encoder ---------------------

def init_encoder_params(key, vocab=100, n_types=2, max_len=8, hidden=128):
    k1, k2, k3, k4 = jax.random.split(key, 4)
    return {
        "tok_emb": jax.random.normal(k1, (vocab, hidden), jnp.float32) * 0.02,
        "type_emb": jax.random.normal(k2, (n_types, hidden), jnp.float32) * 0.02,
        "pos_emb": jax.random.normal(k3, (max_len, hidden), jnp.float32) * 0.02,
        "w": jax.random.normal(k4, (hidden, hidden), jnp.float32) * 0.02,
        "b": jnp.zeros((hidden,), jnp.float32),
    }


def tiny_dense_encoder(params, input_ids, token_type_ids, attention_mask,
                       out_dtype=jnp.float32):
    """Mimics HF-style encoder output: returns a tuple whose [0] is (N, L, H).
    The output cast (bf16 handoff) is part of the encoder epilogue so it fuses
    into the producer under jit instead of a separate HBM round trip."""
    L = input_ids.shape[1]
    h = (params["tok_emb"][input_ids]
         + params["type_emb"][token_type_ids]
         + params["pos_emb"][None, :L, :])
    h = jnp.tanh(h @ params["w"] + params["b"])
    h = h * attention_mask[..., None].astype(h.dtype)
    return (h.astype(out_dtype),)


# ------------------------------ RerankNet forward ------------------------------

def rerank_forward(encoder_params, sparse_weight, x, block_b=None):
    query_token, candidate_tokens, candidate_s_scores = x
    batch_size, topk, max_length = candidate_tokens["input_ids"].shape

    # query: (B, 1, L) -> squeeze(1) -> encode -> CLS token [:, 0] -> (B, H) bf16
    q_out = tiny_dense_encoder(
        encoder_params,
        jnp.squeeze(query_token["input_ids"], axis=1),
        jnp.squeeze(query_token["token_type_ids"], axis=1),
        jnp.squeeze(query_token["attention_mask"], axis=1),
        out_dtype=jnp.bfloat16,
    )
    query_embed = q_out[0][:, 0]                                      # (B, H)

    # candidates: (B, topk, L) -> (B*topk, L) -> encode -> CLS -> (B, topk, H) bf16
    c_out = tiny_dense_encoder(
        encoder_params,
        candidate_tokens["input_ids"].reshape(-1, max_length),
        candidate_tokens["token_type_ids"].reshape(-1, max_length),
        candidate_tokens["attention_mask"].reshape(-1, max_length),
        out_dtype=jnp.bfloat16,
    )
    candidate_embeds = c_out[0][:, 0].reshape(batch_size, topk, -1)   # (B, topk, H)

    # hot path in Pallas: fused batched dot + sparse_weight * s_scores
    return rerank_score(sparse_weight, candidate_s_scores, query_embed,
                        candidate_embeds, block_b=block_b)


# ------------------------------------ main -------------------------------------

if __name__ == "__main__":
    B, TOPK, L, H, VOCAB = 32, 16, 8, 128, 100
    key = jax.random.PRNGKey(0)
    k_enc, k_q, k_c, k_s = jax.random.split(key, 4)

    encoder_params = init_encoder_params(k_enc, vocab=VOCAB, max_len=L, hidden=H)
    sparse_weight = jnp.array([2.0], dtype=jnp.float32)   # learnable scalar

    query_token = {
        "input_ids": jax.random.randint(k_q, (B, 1, L), 0, VOCAB, dtype=jnp.int32),
        "token_type_ids": jnp.zeros((B, 1, L), jnp.int32),
        "attention_mask": jnp.ones((B, 1, L), jnp.int32),
    }
    candidate_tokens = {
        "input_ids": jax.random.randint(k_c, (B, TOPK, L), 0, VOCAB, dtype=jnp.int32),
        "token_type_ids": jnp.zeros((B, TOPK, L), jnp.int32),
        "attention_mask": jnp.ones((B, TOPK, L), jnp.int32),
    }
    candidate_s_scores = jax.random.uniform(k_s, (B, TOPK), jnp.float32)

    x = (query_token, candidate_tokens, candidate_s_scores)

    # jitted end-to-end forward: encoder + bf16 handoff + Pallas scoring kernel.
    # B=32 with tb auto-selected as 16 -> grid=(2,): exercises the pipelined grid.
    fwd = jax.jit(lambda p, w, inp: rerank_forward(p, w, inp))
    score = jax.block_until_ready(fwd(encoder_params, sparse_weight, x))

    # pure-JAX reference of the kernel math (same bf16 handoff, f32 accumulation)
    q_ref = tiny_dense_encoder(
        encoder_params,
        jnp.squeeze(query_token["input_ids"], 1),
        jnp.squeeze(query_token["token_type_ids"], 1),
        jnp.squeeze(query_token["attention_mask"], 1),
        out_dtype=jnp.bfloat16,
    )[0][:, 0]
    c_ref = tiny_dense_encoder(
        encoder_params,
        candidate_tokens["input_ids"].reshape(-1, L),
        candidate_tokens["token_type_ids"].reshape(-1, L),
        candidate_tokens["attention_mask"].reshape(-1, L),
        out_dtype=jnp.bfloat16,
    )[0][:, 0].reshape(B, TOPK, H)
    d_ref = jnp.einsum("bh,bkh->bk",
                       q_ref.astype(jnp.float32), c_ref.astype(jnp.float32))
    ref = sparse_weight[0] * candidate_s_scores + d_ref

    assert score.shape == (B, TOPK)
    assert jnp.allclose(score, ref, atol=1e-3, rtol=1e-3)
    print("KERNEL_OK")
</pallas_src>

<mosaic_0001>
module attributes {stable_mosaic.version = 11 : i64} {
  func.func @rerank_score_kernel(%arg0: i32, %arg1: memref<1xf32, #tpu.memory_space<smem>>, %arg2: memref<16x16xf32, #tpu.memory_space<vmem>>, %arg3: memref<16x128xbf16, #tpu.memory_space<vmem>>, %arg4: memref<16x16x128xbf16, #tpu.memory_space<vmem>>, %arg5: memref<16x16xf32, #tpu.memory_space<vmem>>) attributes {dimension_semantics = [#tpu.dimension_semantics<parallel>], iteration_bounds = array<i64: 2>, scalar_prefetch = 0 : i64, scratch_operands = 0 : i64, tpu.core_type = #tpu.core_type<tc>, window_params = [{transform_indices = @transform_0, window_bounds = array<i64: 1>}, {transform_indices = @transform_1, window_bounds = array<i64: 16, 16>}, {transform_indices = @transform_2, window_bounds = array<i64: 16, 128>}, {transform_indices = @transform_3, window_bounds = array<i64: 16, 16, 128>}, {transform_indices = @transform_4, window_bounds = array<i64: 16, 16>}]} {
    %c0 = arith.constant 0 : index
    %c0_0 = arith.constant 0 : index
    %0 = vector.load %arg3[%c0, %c0_0] : memref<16x128xbf16, #tpu.memory_space<vmem>>, vector<16x128xbf16>
    %1 = arith.extf %0 : vector<16x128xbf16> to vector<16x128xf32>
    %c0_1 = arith.constant 0 : index
    %c0_2 = arith.constant 0 : index
    %c0_3 = arith.constant 0 : index
    %2 = vector.load %arg4[%c0_1, %c0_2, %c0_3] : memref<16x16x128xbf16, #tpu.memory_space<vmem>>, vector<16x16x128xbf16>
    %3 = arith.extf %2 : vector<16x16x128xbf16> to vector<16x16x128xf32>
    %4 = vector.shape_cast %1 : vector<16x128xf32> to vector<16x1x128xf32>
    %5 = vector.broadcast %4 : vector<16x1x128xf32> to vector<16x16x128xf32>
    %6 = arith.mulf %3, %5 : vector<16x16x128xf32>
    %cst = arith.constant dense<0.000000e+00> : vector<16x16xf32>
    %7 = vector.multi_reduction <add>, %6, %cst [2] : vector<16x16x128xf32> to vector<16x16xf32>
    %c0_4 = arith.constant 0 : index
    %8 = memref.load %arg1[%c0_4] : memref<1xf32, #tpu.memory_space<smem>>
    %c0_5 = arith.constant 0 : index
    %c0_6 = arith.constant 0 : index
    %9 = vector.load %arg2[%c0_5, %c0_6] : memref<16x16xf32, #tpu.memory_space<vmem>>, vector<16x16xf32>
    %10 = vector.broadcast %8 : f32 to vector<16x16xf32>
    %11 = arith.mulf %10, %9 : vector<16x16xf32>
    %12 = arith.addf %11, %7 : vector<16x16xf32>
    %c0_7 = arith.constant 0 : index
    %c0_8 = arith.constant 0 : index
    %13 = vector.load %arg5[%c0_7, %c0_8] : memref<16x16xf32, #tpu.memory_space<vmem>>, vector<16x16xf32>
    tpu.vector_store %arg5[%c0_7, %c0_8], %12 {strides = array<i32>} : memref<16x16xf32, #tpu.memory_space<vmem>>, vector<16x16xf32>,
    return
  }
  func.func @transform_0(%arg0: i32) -> i32 {
    %c0_i32 = arith.constant 0 : i32
    %c0_i32_0 = arith.constant 0 : i32
    return %c0_i32 : i32
  }
  func.func @transform_1(%arg0: i32) -> (i32, i32) {
    %c0_i32 = arith.constant 0 : i32
    %c0_i32_0 = arith.constant 0 : i32
    return %arg0, %c0_i32 : i32, i32
  }
  func.func @transform_2(%arg0: i32) -> (i32, i32) {
    %c0_i32 = arith.constant 0 : i32
    %c0_i32_0 = arith.constant 0 : i32
    return %arg0, %c0_i32 : i32, i32
  }
  func.func @transform_3(%arg0: i32) -> (i32, i32, i32) {
    %c0_i32 = arith.constant 0 : i32
    %c0_i32_0 = arith.constant 0 : i32
    %c0_i32_1 = arith.constant 0 : i32
    return %arg0, %c0_i32, %c0_i32_0 : i32, i32, i32
  }
  func.func @transform_4(%arg0: i32) -> (i32, i32) {
    %c0_i32 = arith.constant 0 : i32
    %c0_i32_0 = arith.constant 0 : i32
    return %arg0, %c0_i32 : i32, i32
  }
}

</mosaic_0001>

<bundles_post_ra>
// kernel: _lambda_.1
= control target key start
LH: loop header
LB: loop body
LE: loop exit
PB: predicated region body
PF: predicated region fallthrough
CT: control target
= control target key end

     0   :  { %s803_s17 = smov 0   ;;  %s959_s0 = inlined_call_operand.<no memory space> [shape: f32[1], index: 0, kind: input, shape index: {}]   ;;  %s960_s1 = inlined_call_operand.vmem [shape: f32[32,16], index: 1, kind: input, shape index: {}]   ;;  %s961_s2 = inlined_call_operand.vmem [shape: bf16[32,128], index: 2, kind: input, shape index: {}]   ;;  %s962_s3 = inlined_call_operand.vmem [shape: bf16[32,16,128], index: 3, kind: input, shape index: {}]   ;;  %s963_s4 = inlined_call_operand.vmem [shape: f32[32,16], index: 4, kind: output, shape index: {}]  }
   0x1   :  { %9 = sst [smem:[#allocation2]] %s959_s0 }
   0x2 LB: > { %s659_s18 = sadd.s32 4294967295, %s773_s17   ;;  %p663_p0 = scmp.ge.s32.totalorder %s773_s17, 1  ;;  %s773_s17 = sphi %s803_s17, %s15_s17  }
   0x3   : > { %p187_p1 = scmp.lt.s32.totalorder %s773_s17, 3 }
   0x5   : > { %p188_p2 = pnand %p663_p0, %p187_p1 }
   0x6   : > { %s664_s19 = sshll.u32 (!%p188_p2), %s659_s18, 1  ;;  %s668_s20 = sshll.u32 (!%p188_p2), %s659_s18, 4 }
   0x7   : > { %191 = sbr.rel (%p188_p2) target bundleno = 227 (0xe3), region = 36  ;;  %p225_p3 = scmp.lt.s32.totalorder (!%p188_p2), %s664_s19, 3 }
   0x8   : > { %p237_p4 = scmp.lt.s32.totalorder (!%p188_p2), %s668_s20, 31  ;;  %s880_s28 = sld [smem:[#allocation2]] (!%p188_p2) }
   0xc   : > { %s965_s19 = smov (!%p225_p3, %s664_s19), 3  ;;  %s967_s20 = smov (!%p237_p4, %s668_s20), 31  ;;  %vm504_vm0 = vcmask 130112   ;;  %vm551_vm1 = vcmask 1041409   ;;  %vm553_vm2 = vcmask 1042434   ;;  %vm555_vm3 = vcmask 1043459  }
   0xd   : > { %s667_s0 = sshll.u32 %s965_s19, 2  ;;  %s675_s24 = sshll.u32 %s967_s20, 3  ;;  %vm557_vm4 = vcmask 1044484   ;;  %vm559_vm5 = vcmask 1045509   ;;  %vm561_vm6 = vcmask 1046534   ;;  %vm563_vm7 = vcmask 1047559  }
   0xe   : > { %s234_s23 = scalar_lea.vmem %s961_s2, %s667_s0  ;;  %s820_s27 = scalar_lea.vmem %s962_s3, %s675_s24  ;;  %vm576_vm8 = vcmask 130048  }
   0xf   : > { %v822_v0 = vld [vmem:[%s234_s23] sm:$0xff]   ;;  %v745_v3 = vld [vmem:[%s820_s27 + $0x10] sm:$0xff]   ;;  %v744_v4 = vld [vmem:[%s820_s27 + $0x8] sm:$0xff]   ;;  %s665_s29 = sshll.u32 %s965_s19, 3 }
  0x10   : > { %v678_v1 = vunpack.c.l.bf16 %v822_v0  ;;  %v681_v2 = vld [vmem:[%s820_s27] sm:$0xff]   ;;  %v690_v6 = vunpack.c.l.bf16 %v745_v3  ;;  %v686_v9 = vunpack.c.l.bf16 %v744_v4  ;;  %v691_v17 = vunpack.c.h.bf16 %v745_v3  ;;  %v746_v21 = vld [vmem:[%s820_s27 + $0x18] sm:$0xff]   ;;  %v748_v35 = vld [vmem:[%s820_s27 + $0x28] sm:$0xff]   ;;  %s896_s6 = scalar_lea.vmem %s960_s1, %s665_s29  ;;  %s247_s9 = scalar_lea.vmem %s963_s4, %s665_s29 }
  0x11   : > { %v682_v5 = vunpack.c.l.bf16 %v681_v2  ;;  %v683_v16 = vunpack.c.h.bf16 %v681_v2  ;;  %v687_v18 = vunpack.c.h.bf16 %v744_v4  ;;  %v747_v25 = vld [vmem:[%s820_s27 + $0x20] sm:$0xff]   ;;  %v694_v26 = vunpack.c.l.bf16 %v746_v21  ;;  %v749_v42 = vld [vmem:[%s820_s27 + $0x30] sm:$0xff]   ;;  %v833_v46 = vld [vmem:[%s820_s27 + $0x38] sm:$0xff]  }
  0x12   : > { %v333_v7 = vperm.slane %v678_v1, 0  ;;  %v320_v8 = vrot.slane %v678_v1, 2  ;;  %v319_v10 = vrot.slane %v678_v1, 1  ;;  %v321_v20 = vrot.slane %v678_v1, 3  ;;  %v751_v54 = vld [vmem:[%s820_s27 + $0x40] sm:$0xff]   ;;  %v752_v58 = vld [vmem:[%s820_s27 + $0x48] sm:$0xff]  }
  0x13   : > { %v322_v24 = vrot.slane %v678_v1, 4  ;;  %v698_v28 = vunpack.c.l.bf16 %v747_v25  ;;  %v695_v30 = vunpack.c.h.bf16 %v746_v21  ;;  %v323_v34 = vrot.slane %v678_v1, 5  ;;  %v753_v4 = vld [vmem:[%s820_s27 + $0x50] sm:$0xff]  }
  0x14   : > { %v365_v11 = vmul.f32 %v682_v5, %v333_v7  ;;  %v335_v12 = vperm.slane %v320_v8, 0  ;;  %v334_v13 = vperm.slane %v319_v10, 0  ;;  %v366_v19 = vmul.f32 %v683_v16, %v333_v7 }
  0x15   : > { %v336_v27 = vperm.slane %v321_v20, 0  ;;  %v337_v29 = vperm.slane %v322_v24, 0  ;;  %v699_v36 = vunpack.c.h.bf16 %v747_v25  ;;  %v703_v37 = vunpack.c.h.bf16 %v748_v35  ;;  %v756_v25 = vld [vmem:[%s820_s27 + $0x68] sm:$0xff]  }
  0x16   : > { %397 = vadd.xlane.f32.xlu0 %v365_v11  ;;  %v369_v14 = vmul.f32 %v690_v6, %v335_v12  ;;  %v367_v15 = vmul.f32 %v686_v9, %v334_v13  ;;  %v370_v22 = vmul.f32 %v691_v17, %v335_v12  ;;  %v368_v23 = vmul.f32 %v687_v18, %v334_v13  ;;  %v754_v11 = vld [vmem:[%s820_s27 + $0x58] sm:$0xff]  }
  0x17   : > { %v371_v31 = vmul.f32 %v694_v26, %v336_v27  ;;  %v373_v32 = vmul.f32 %v698_v28, %v337_v29  ;;  %v372_v33 = vmul.f32 %v695_v30, %v336_v27  ;;  %v338_v38 = vperm.slane %v323_v34, 0  ;;  %v757_v34 = vld [vmem:[%s820_s27 + $0x70] sm:$0xff]  }
  0x18   : > { %405 = vadd.xlane.f32.xlu2 %v369_v14  ;;  %401 = vadd.xlane.f32.xlu1 %v367_v15  ;;  %v702_v39 = vunpack.c.l.bf16 %v748_v35  ;;  %v374_v40 = vmul.f32 %v699_v36, %v337_v29  ;;  %v324_v41 = vrot.slane %v678_v1, 6  ;;  %v325_v45 = vrot.slane %v678_v1, 7  ;;  %v755_v15 = vld [vmem:[%s820_s27 + $0x60] sm:$0xff]  }
  0x19   : > { %v376_v43 = vmul.f32 %v703_v37, %v338_v38  ;;  %v706_v47 = vunpack.c.l.bf16 %v749_v42  ;;  %v710_v49 = vunpack.c.l.bf16 %v833_v46  ;;  %v707_v51 = vunpack.c.h.bf16 %v749_v42 }
  0x1a   : > { %v375_v44 = vmul.f32 %v702_v39, %v338_v38  ;;  %v339_v48 = vperm.slane %v324_v41, 0  ;;  %v836_v50 = vperm.slane %v325_v45, 0  ;;  %v839_v52 = vunpack.c.h.bf16 %v822_v0  ;;  %v758_v41 = vld [vmem:[%s820_s27 + $0x78] sm:$0xff]  }
  0x1b   : > { %v714_v59 = vunpack.c.l.bf16 %v751_v54  ;;  %v718_v61 = vunpack.c.l.bf16 %v752_v58  ;;  %v715_v63 = vunpack.c.h.bf16 %v751_v54  ;;  %v719_v5 = vunpack.c.h.bf16 %v752_v58 }
  0x1c   : > { %v377_v53 = vmul.f32 %v706_v47, %v339_v48  ;;  %v379_v55 = vmul.f32 %v710_v49, %v836_v50  ;;  %v378_v56 = vmul.f32 %v707_v51, %v339_v48  ;;  %v326_v57 = vrot.slane %v839_v52, 1 }
  0x1d   : > { %v341_v60 = vperm.slane %v839_v52, 0  ;;  %v327_v3 = vrot.slane %v839_v52, 2  ;;  %v723_v6 = vunpack.c.h.bf16 %v753_v4  ;;  %v722_v8 = vunpack.c.l.bf16 %v753_v4 }
  0x1e   : > { %399 = vadd.xlane.f32.xlu0 %v366_v19  ;;  %v342_v62 = vperm.slane %v326_v57, 0  ;;  %v328_v10 = vrot.slane %v839_v52, 3  ;;  %v329_v14 = vrot.slane %v839_v52, 4  ;;  %v726_v16 = vunpack.c.l.bf16 %v754_v11 }
  0x1f   : > { %v381_v0 = vmul.f32 %v714_v59, %v341_v60  ;;  %v382_v2 = vmul.f32 %v715_v63, %v341_v60  ;;  %v343_v7 = vperm.slane %v327_v3, 0  ;;  %v730_v18 = vunpack.c.l.bf16 %v755_v15 }
  0x20   : > { %407 = vadd.xlane.f32.xlu2 %v370_v22  ;;  %403 = vadd.xlane.f32.xlu1 %v368_v23  ;;  %v383_v1 = vmul.f32 %v718_v61, %v342_v62  ;;  %v384_v9 = vmul.f32 %v719_v5, %v342_v62  ;;  %v344_v17 = vperm.slane %v328_v10, 0  ;;  %v345_v19 = vperm.slane %v329_v14, 0 }
  0x21   : > { %v386_v12 = vmul.f32 %v723_v6, %v343_v7  ;;  %v385_v13 = vmul.f32 %v722_v8, %v343_v7  ;;  %v727_v20 = vunpack.c.h.bf16 %v754_v11  ;;  %v330_v24 = vrot.slane %v839_v52, 5 }
  0x22   : > { %v387_v21 = vmul.f32 %v726_v16, %v344_v17  ;;  %v389_v22 = vmul.f32 %v730_v18, %v345_v19  ;;  %v731_v26 = vunpack.c.h.bf16 %v755_v15  ;;  %v735_v27 = vunpack.c.h.bf16 %v756_v25 }
  0x23   : > { %v388_v23 = vmul.f32 %v727_v20, %v344_v17  ;;  %v346_v28 = vperm.slane %v330_v24, 0  ;;  %v734_v29 = vunpack.c.l.bf16 %v756_v25  ;;  %v711_v35 = vunpack.c.h.bf16 %v833_v46 }
  0x24   : > { %v390_v30 = vmul.f32 %v731_v26, %v345_v19  ;;  %v739_v36 = vunpack.c.h.bf16 %v757_v34  ;;  %v738_v38 = vunpack.c.l.bf16 %v757_v34  ;;  %v743_v47 = vunpack.c.h.bf16 %v758_v41 }
  0x25   : > { %v380_v39 = vmul.f32 %v711_v35, %v836_v50  ;;  %v499_v49 = vlaneseq }
  0x26   : > { %409 = vadd.xlane.f32.xlu0 %v371_v31  ;;  %v392_v31 = vmul.f32 %v735_v27, %v346_v28 }
  0x27   : > { %v860_v50 = vand.u32 127, %v499_v49 }
  0x28   : > { %413 = vadd.xlane.f32.xlu2 %v373_v32  ;;  %411 = vadd.xlane.f32.xlu1 %v372_v33  ;;  %v391_v32 = vmul.f32 %v734_v29, %v346_v28  ;;  %v331_v33 = vrot.slane %v839_v52, 6 }
  0x2a   : > { %v347_v37 = vperm.slane %v331_v33, 0 }
  0x2c   : > { %v394_v42 = vmul.f32 %v739_v36, %v347_v37 }
  0x2e   : > { %415 = vadd.xlane.f32.xlu0 %v374_v40  ;;  %v332_v40 = vrot.slane %v839_v52, 7  ;;  %v863_v52 = vadd.s32 4294967288, %v860_v50 }
  0x30   : > { %419 = vadd.xlane.f32.xlu2 %v376_v43  ;;  %417 = vadd.xlane.f32.xlu1 %v375_v44  ;;  %v393_v43 = vmul.f32 %v738_v38, %v347_v37  ;;  %v742_v44 = vunpack.c.l.bf16 %v758_v41  ;;  %v348_v45 = vperm.slane %v332_v40, 0  ;;  %v462_v40 = vld [vmem:[%s896_s6] sm:$0xff] }
  0x32   : > { %v395_v48 = vmul.f32 %v742_v44, %v348_v45  ;;  %v396_v46 = vmul.f32 %v743_v47, %v348_v45 }
  0x36   : > { %421 = vadd.xlane.f32.xlu0 %v377_v53 }
  0x38   : > { %425 = vadd.xlane.f32.xlu2 %v379_v55  ;;  %423 = vadd.xlane.f32.xlu1 %v378_v56 }
  0x3e   : > { %429 = vadd.xlane.f32.xlu0 %v381_v0 }
  0x40   : > { %433 = vadd.xlane.f32.xlu2 %v383_v1  ;;  %431 = vadd.xlane.f32.xlu1 %v382_v2 }
  0x46   : > { %435 = vadd.xlane.f32.xlu0 %v384_v9 }
  0x48   : > { %439 = vadd.xlane.f32.xlu2 %v386_v12  ;;  %437 = vadd.xlane.f32.xlu1 %v385_v13 }
  0x4e   : > { %441 = vadd.xlane.f32.xlu0 %v387_v21 }
  0x50   : > { %445 = vadd.xlane.f32.xlu2 %v389_v22  ;;  %443 = vadd.xlane.f32.xlu1 %v388_v23 }
  0x56   : > { %447 = vadd.xlane.f32.xlu0 %v390_v30 }
  0x58   : > { %451 = vadd.xlane.f32.xlu2 %v392_v31  ;;  %449 = vadd.xlane.f32.xlu1 %v391_v32 }
  0x5e   : > { %427 = vadd.xlane.f32.xlu0 %v380_v39  ;;  %v464_v39 = vstv %s880_s28 }
  0x60   : > { %455 = vadd.xlane.f32.xlu2 %v394_v42  ;;  %453 = vadd.xlane.f32.xlu1 %v393_v43 }
  0x66   : > { %457 = vadd.xlane.f32.xlu0 %v395_v48 }
  0x68   : > { %459 = vadd.xlane.f32.xlu1 %v396_v46 }
  0x89   : > { %v398_v51 = vpop.xlane.xlu0 %397 }
  0x8a   : > { %v501_v59 = vperm.slane %v398_v51, %v860_v50  ;;  %v465_v51 = vmul.f32 %v464_v39, %v462_v40 }
  0x8b   : > { %v406_v53 = vpop.xlane.xlu2 %405  ;;  %v402_v54 = vpop.xlane.xlu1 %401 }
  0x8c   : > { %v506_v60 = vperm.slane %v402_v54, %v860_v50  ;;  %v509_v19 = vperm.slane %v406_v53, %v860_v50 }
  0x91   : > { %v400_v55 = vpop.xlane.xlu0 %399 }
  0x92   : > { %v503_v56 = vperm.slane %v400_v55, %v863_v52 }
  0x93   : > { %v408_v57 = vpop.xlane.xlu2 %407  ;;  %v404_v58 = vpop.xlane.xlu1 %403 }
  0x94   : > { %v507_v61 = vperm.slane %v404_v58, %v863_v52  ;;  %v505_v62 = vsel %vm504_vm0, %v503_v56, %v501_v59  ;;  %v510_v20 = vperm.slane %v408_v57, %v863_v52 }
  0x96   : > { %v508_v63 = vsel %vm504_vm0, %v507_v61, %v506_v60  ;;  %v511_v26 = vsel %vm504_vm0, %v510_v20, %v509_v19 }
  0x97   : > { %v552_v0 = vsel %vm551_vm1, %v508_v63, %v505_v62 }
  0x98   : > { %v554_v35 = vsel %vm553_vm2, %v511_v26, %v552_v0 }
  0x99   : > { %v410_v1 = vpop.xlane.xlu0 %409 }
  0x9a   : > { %v512_v21 = vperm.slane %v410_v1, %v860_v50 }
  0x9b   : > { %v414_v2 = vpop.xlane.xlu2 %413  ;;  %v412_v3 = vpop.xlane.xlu1 %411 }
  0x9c   : > { %v513_v22 = vperm.slane %v412_v3, %v863_v52  ;;  %v515_v23 = vperm.slane %v414_v2, %v860_v50 }
  0x9e   : > { %v514_v27 = vsel %vm504_vm0, %v513_v22, %v512_v21 }
  0x9f   : > { %v556_v36 = vsel %vm555_vm3, %v514_v27, %v554_v35 }
  0xa1   : > { %v416_v4 = vpop.xlane.xlu0 %415 }
  0xa2   : > { %v516_v24 = vperm.slane %v416_v4, %v863_v52 }
  0xa3   : > { %v420_v5 = vpop.xlane.xlu2 %419  ;;  %v418_v6 = vpop.xlane.xlu1 %417 }
  0xa4   : > { %v519_v28 = vperm.slane %v420_v5, %v863_v52  ;;  %v518_v29 = vperm.slane %v418_v6, %v860_v50  ;;  %v517_v32 = vsel %vm504_vm0, %v516_v24, %v515_v23 }
  0xa5   : > { %v558_v41 = vsel %vm557_vm4, %v517_v32, %v556_v36 }
  0xa6   : > { %v520_v42 = vsel %vm504_vm0, %v519_v28, %v518_v29 }
  0xa7   : > { %v560_v57 = vsel %vm559_vm5, %v520_v42, %v558_v41 }
  0xa9   : > { %v422_v7 = vpop.xlane.xlu0 %421 }
  0xaa   : > { %v521_v33 = vperm.slane %v422_v7, %v860_v50 }
  0xab   : > { %v872_v8 = vpop.xlane.xlu2 %425  ;;  %v424_v9 = vpop.xlane.xlu1 %423 }
  0xac   : > { %v522_v34 = vperm.slane %v424_v9, %v863_v52  ;;  %v524_v43 = vperm.slane %v872_v8, %v860_v50 }
  0xae   : > { %v523_v44 = vsel %vm504_vm0, %v522_v34, %v521_v33 }
  0xaf   : > { %v562_v61 = vsel %vm561_vm6, %v523_v44, %v560_v57 }
  0xb1   : > { %v430_v10 = vpop.xlane.xlu0 %429 }
  0xb2   : > { %v527_v45 = vperm.slane %v430_v10, %v860_v50 }
  0xb3   : > { %v434_v11 = vpop.xlane.xlu2 %433  ;;  %v432_v12 = vpop.xlane.xlu1 %431 }
  0xb4   : > { %v530_v37 = vperm.slane %v434_v11, %v860_v50  ;;  %v528_v47 = vperm.slane %v432_v12, %v863_v52 }
  0xb6   : > { %v529_v62 = vsel %vm504_vm0, %v528_v47, %v527_v45 }
  0xb9   : > { %v436_v13 = vpop.xlane.xlu0 %435 }
  0xba   : > { %v531_v38 = vperm.slane %v436_v13, %v863_v52 }
  0xbb   : > { %v440_v14 = vpop.xlane.xlu2 %439  ;;  %v438_v15 = vpop.xlane.xlu1 %437 }
  0xbc   : > { %v534_v48 = vperm.slane %v440_v14, %v863_v52  ;;  %v533_v46 = vperm.slane %v438_v15, %v860_v50  ;;  %v532_v53 = vsel %vm504_vm0, %v531_v38, %v530_v37  ;;  %v463_v14 = vld [vmem:[%s896_s6 + $0x8] sm:$0xff] }
  0xbd   : > { %v565_v1 = vsel %vm551_vm1, %v532_v53, %v529_v62  ;;  %v466_v20 = vmul.f32 %v464_v39, %v463_v14 }
  0xbe   : > { %v535_v2 = vsel %vm504_vm0, %v534_v48, %v533_v46 }
  0xbf   : > { %v566_v11 = vsel %vm553_vm2, %v535_v2, %v565_v1 }
  0xc1   : > { %v874_v16 = vpop.xlane.xlu0 %441 }
  0xc2   : > { %v536_v54 = vperm.slane %v874_v16, %v860_v50 }
  0xc3   : > { %v876_v17 = vpop.xlane.xlu2 %445  ;;  %v444_v18 = vpop.xlane.xlu1 %443 }
  0xc4   : > { %v537_v55 = vperm.slane %v444_v18, %v863_v52  ;;  %v539_v58 = vperm.slane %v876_v17, %v860_v50 }
  0xc6   : > { %v538_v4 = vsel %vm504_vm0, %v537_v55, %v536_v54 }
  0xc7   : > { %v567_v12 = vsel %vm555_vm3, %v538_v4, %v566_v11 }
  0xc9   : > { %v448_v25 = vpop.xlane.xlu0 %447 }
  0xca   : > { %v540_v59 = vperm.slane %v448_v25, %v863_v52 }
  0xcb   : > { %v452_v30 = vpop.xlane.xlu2 %451  ;;  %v450_v31 = vpop.xlane.xlu1 %449 }
  0xcc   : > { %v543_v5 = vperm.slane %v452_v30, %v863_v52  ;;  %v542_v6 = vperm.slane %v450_v31, %v860_v50  ;;  %v541_v8 = vsel %vm504_vm0, %v540_v59, %v539_v58 }
  0xcd   : > { %v568_v15 = vsel %vm557_vm4, %v541_v8, %v567_v12 }
  0xce   : > { %v544_v16 = vsel %vm504_vm0, %v543_v5, %v542_v6 }
  0xcf   : > { %v569_v22 = vsel %vm559_vm5, %v544_v16, %v568_v15 }
  0xd1   : > { %v428_v49 = vpop.xlane.xlu0 %427 }
  0xd2   : > { %v525_v56 = vperm.slane %v428_v49, %v863_v52 }
  0xd3   : > { %v454_v60 = vpop.xlane.xlu1 %453  ;;  %v456_v0 = vpop.xlane.xlu2 %455 }
  0xd4   : > { %v526_v63 = vsel %vm504_vm0, %v525_v56, %v524_v43  ;;  %v546_v9 = vperm.slane %v456_v0, %v863_v52  ;;  %v545_v10 = vperm.slane %v454_v60, %v860_v50 }
  0xd5   : > { %v564_v3 = vsel %vm563_vm7, %v526_v63, %v562_v61 }
  0xd6   : > { %v574_v7 = vadd.f32 %v564_v3, %v465_v51  ;;  %v547_v18 = vsel %vm504_vm0, %v546_v9, %v545_v10 }
  0xd7   : > { %v570_v23 = vsel %vm561_vm6, %v547_v18, %v569_v22 }
  0xd8   : > { %577 = vst.msk [vmem:[%s247_s9] sm:$0xff] %vm576_vm8, %v574_v7 }
  0xd9   : > { %v458_v13 = vpop.xlane.xlu0 %457 }
  0xda   : > { %v548_v17 = vperm.slane %v458_v13, %v860_v50 }
  0xdb   : > { %v460_v19 = vpop.xlane.xlu1 %459 }
  0xdc   : > { %v549_v21 = vperm.slane %v460_v19, %v863_v52 }
  0xde   : > { %v550_v24 = vsel %vm504_vm0, %v549_v21, %v548_v17 }
  0xdf   : > { %v571_v25 = vsel %vm563_vm7, %v550_v24, %v570_v23 }
  0xe0   : > { %v575_v26 = vadd.f32 %v571_v25, %v466_v20 }
  0xe2   : > { %578 = vst.msk [vmem:[%s247_s9 + $0x8] sm:$0xff] %vm576_vm8, %v575_v26 }
  0xe3 PF: > { %s15_s17 = sadd.s32 1, %s773_s17  }
  0xe4   : > { %p12_p5 = scmp.ge.s32.totalorder %s15_s17, 4  }
  0xe6   :  { %14 = sbr.rel (!%p12_p5) target bundleno = 2 (0x2), region = 72 }

</bundles_post_ra>
